<compile_context>
chip_gen: v7x
topology: tpu7x:2x2x1
jax: 0.10.0
libtpu: 0.0.40
codegen_flags: <defaults>
</compile_context>

<pallas_src>
import jax
import jax.numpy as jnp
from jax.experimental import pallas as pl
from jax.experimental.pallas import tpu as pltpu


def _cdiv(a, b):
    return -(-a // b)


def _make_kernel(l_real, use_mxu):
    """Kernel closure: l_real (the un-padded spatial length) and the spatial-gate
    contraction path are static."""

    def kernel(x_ref, pc_ref, u_ref, w1t_ref, b1_ref, w2t_ref, b2_ref, kap_ref, o_ref):
        x = x_ref[...].astype(jnp.float32)                 # (TB, C, Lp), f32 compute
        TB, C, Lp = x.shape

        # ---- mean over the *real* L of Conv1d(k=3, pad=1, groups=C), shift-free ----
        # mean_l sf = [(w0+w1+w2)*S - w0*x[L-1] - w2*x[0]] / L + cb
        # (zero padding of L is sum-neutral for S; boundaries use static real-L indices)
        pc = pc_ref[...]                                   # (4, C)
        s_row   = jnp.sum(x, axis=2)                       # (TB, C)
        x_first = jnp.sum(x[:, :, 0:1], axis=2)            # (TB, C)
        x_last  = jnp.sum(x[:, :, l_real - 1:l_real], axis=2)
        m = s_row * pc[0:1] - x_last * pc[1:2] - x_first * pc[2:3] + pc[3:4]

        # ---- channel MLP: Linear -> ReLU -> Linear -> Sigmoid (batched MXU matmuls) ----
        h = jnp.maximum(
            jnp.dot(m, w1t_ref[...], preferred_element_type=jnp.float32) + b1_ref[...], 0.0)
        g = jax.nn.sigmoid(
            jnp.dot(h, w2t_ref[...], preferred_element_type=jnp.float32) + b2_ref[...])

        # ---- spatial gate: sigmoid( sum_c smw[c]*sf[b,c,l] + smb ) ----
        # sum_c smw*sf = y0[b,l-1] + y1[b,l] + y2[b,l+1] + (smw.cb + smb),
        # with y_k[b,l] = sum_c (smw*w_k)[c] * x[b,c,l].
        if use_mxu:
            u2 = jnp.broadcast_to(u_ref[...][None], (TB, 3, C))          # (TB, 3, C)
            y = jnp.einsum('bkc,bcl->bkl', u2, x,
                           preferred_element_type=jnp.float32)           # (TB, 3, Lp)
            y0, y1, y2 = y[:, 0, :], y[:, 1, :], y[:, 2, :]
        else:
            u = u_ref[...]                                               # (3, C, 1)
            y0 = jnp.sum(x * u[0:1], axis=1)                             # (TB, Lp)
            y1 = jnp.sum(x * u[1:2], axis=1)
            y2 = jnp.sum(x * u[2:3], axis=1)
        lane = jax.lax.broadcasted_iota(jnp.int32, (TB, Lp), 1)
        y0s = jnp.where(lane == 0, 0.0, pltpu.roll(y0, shift=1, axis=1))          # y0[b,l-1]
        y2s = jnp.where(lane == l_real - 1, 0.0, pltpu.roll(y2, shift=Lp - 1, axis=1))  # y2[b,l+1]
        sw = jax.nn.sigmoid(y0s + y1 + y2s + kap_ref[...])               # (TB, Lp)

        # ---- gated output (downcast only here) ----
        o_ref[...] = (x * g[:, :, None] * sw[:, None, :]).astype(o_ref.dtype)

    return kernel


def _vmem_limit_bytes():
    """Per-generation scoped-VMEM budget (v7x: 64 MiB/TC -> ~48 MiB; v5e/v6e: 128 -> 96)."""
    cap = 64 << 20
    try:
        info = pltpu.get_tpu_info()
        cap = int(getattr(info, "vmem_capacity_bytes", cap)) or cap
    except Exception:
        pass
    return int(max(32 << 20, min(96 << 20, cap * 3 // 4)))


def _plan_tiling(B, row_bytes_in, row_bytes_out, vmem_limit_bytes):
    """Pick (batch_tile, grid_steps).  Blocks are double-buffered (in + out)."""
    headroom = 2 << 20                                       # resident constants + scratch
    per_row_buffered = 2 * (row_bytes_in + row_bytes_out)
    tb_fit = (vmem_limit_bytes - headroom) // max(1, per_row_buffered)
    if tb_fit < 1:
        # TODO(synk): L-tiled two-pass fallback for C*L too large for one VMEM block.
        raise ValueError("SoftGating1 Pallas kernel: one batch row of x does not fit in "
                         "scoped VMEM; C*L is too large for the un-tiled-L kernel.")
    target_block = 6 << 20                                   # ~4-6 MiB x blocks
    t0 = max(1, min(B, tb_fit, max(1, target_block // max(1, row_bytes_in))))
    s0 = _cdiv(B, t0)
    best = None
    # Small bounded search around the target step count: minimize padded work, prefer
    # an even number of steps (v7x two-TC balance), then fewer steps (less fixed overhead).
    for s in range(max(1, s0 - 2), min(B, s0 + 2) + 1):
        t = _cdiv(B, s)
        if t > tb_fit:
            continue
        steps = _cdiv(B, t)
        padded = steps * t
        odd = 1 if (steps > 1 and steps % 2) else 0
        key = (padded, odd, steps)
        if best is None or key < best[0]:
            best = (key, t, steps)
    _, tb, steps = best
    return tb, steps


def soft_gating1(x, cw, cb, w1, b1, w2, b2, smw, smb, *,
                 io_dtype=jnp.bfloat16, use_mxu_spatial=None):
    """x: (B, C, L).  cw: (C,3) depthwise conv weight, cb: (C,), w1: (H,C), b1: (H,),
    w2: (C,H), b2: (C,), smw: (C,) 1x1-conv weight, smb: () bias.
    io_dtype: dtype of x / output at the HBM boundary (bf16 by default; compute is f32)."""
    B, C, L = x.shape
    H = w1.shape[0]
    io_dtype = jnp.dtype(x.dtype if io_dtype is None else io_dtype)

    # --- fold the tiny parameters into compact, kernel-friendly tensors (XLA side) ---
    inv_l = 1.0 / L
    w0c, w1c, w2c = cw[:, 0], cw[:, 1], cw[:, 2]
    pc = jnp.stack([(w0c + w1c + w2c) * inv_l, w0c * inv_l, w2c * inv_l, cb],
                   axis=0).astype(jnp.float32)                    # (4, C)
    u2d = (smw[None, :] * cw.T).astype(jnp.float32)               # (3, C) = smw[c]*w_k[c]
    kappa = (jnp.dot(smw, cb) + smb).reshape(1, 1).astype(jnp.float32)   # (1, 1)
    w1_t = w1.T.astype(jnp.float32)                               # (C, H)
    b1_r = b1.reshape(1, H).astype(jnp.float32)
    w2_t = w2.T.astype(jnp.float32)                               # (H, C)
    b2_r = b2.reshape(1, C).astype(jnp.float32)

    use_mxu = (C >= 32) if use_mxu_spatial is None else bool(use_mxu_spatial)
    u_arr = u2d if use_mxu else u2d[:, :, None]                   # (3,C) MXU / (3,C,1) VPU

    # --- lane-dense spatial dim: pad L up to a multiple of 128 (zero pad) ---
    Lp = max(128, _cdiv(L, 128) * 128)
    xio = x.astype(io_dtype)
    if Lp != L:
        xio = jnp.pad(xio, ((0, 0), (0, 0), (0, Lp - L)))

    # --- per-generation VMEM budget and batch tiling ---
    vmem_limit = _vmem_limit_bytes()
    row_bytes = C * Lp * io_dtype.itemsize
    tb, steps = _plan_tiling(B, row_bytes, row_bytes, vmem_limit)
    Bp = tb * steps
    if Bp != B:
        xio = jnp.pad(xio, ((0, Bp - B), (0, 0), (0, 0)))

    def const_spec(shape):
        return pl.BlockSpec(shape, lambda i, _s=len(shape): (0,) * _s)

    kernel = _make_kernel(L, use_mxu)

    out = pl.pallas_call(
        kernel,
        out_shape=jax.ShapeDtypeStruct((Bp, C, Lp), io_dtype),
        grid=(steps,),
        in_specs=[
            pl.BlockSpec((tb, C, Lp), lambda i: (i, 0, 0)),  # x, tb batch rows / step
            const_spec(pc.shape),     # conv-weight sums / cb rows
            const_spec(u_arr.shape),  # smw*w_k for the spatial gate
            const_spec(w1_t.shape),   # Linear1 weight (pre-transposed)
            const_spec(b1_r.shape),   # Linear1 bias
            const_spec(w2_t.shape),   # Linear2 weight (pre-transposed)
            const_spec(b2_r.shape),   # Linear2 bias
            const_spec(kappa.shape),  # smw.cb + smb
        ],
        out_specs=pl.BlockSpec((tb, C, Lp), lambda i: (i, 0, 0)),
        compiler_params=pltpu.CompilerParams(
            dimension_semantics=("parallel",),
            vmem_limit_bytes=vmem_limit,
        ),
    )(xio, pc, u_arr, w1_t, b1_r, w2_t, b2_r, kappa)

    if Bp != B or Lp != L:
        out = out[:B, :, :L]
    return out


def ref_forward(x, cw, cb, w1, b1, w2, b2, smw, smb):
    """Pure-JAX reference matching the PyTorch forward (f32)."""
    xp = jnp.pad(x, ((0, 0), (0, 0), (1, 1)))
    sf = (cw[None, :, 0:1] * xp[:, :, :-2]
          + cw[None, :, 1:2] * xp[:, :, 1:-1]
          + cw[None, :, 2:3] * xp[:, :, 2:]) + cb[None, :, None]
    m = sf.mean(-1)                                              # (B, C)
    h = jax.nn.relu(m @ w1.T + b1)                               # (B, H)
    g = jax.nn.sigmoid(h @ w2.T + b2)                            # (B, C)
    sw = jax.nn.sigmoid(jnp.einsum('c,bcl->bl', smw, sf) + smb)  # (B, L)
    return x * g[:, :, None] * sw[:, None, :]


if __name__ == "__main__":
    def make_inputs(key, B, C, L):
        H = max(1, C // 4)
        ks = jax.random.split(key, 9)
        s = 0.2
        x   = jax.random.normal(ks[0], (B, C, L), jnp.float32)
        cw  = s * jax.random.normal(ks[1], (C, 3), jnp.float32)   # Conv1d depthwise (C,1,3)->(C,3)
        cb  = s * jax.random.normal(ks[2], (C,), jnp.float32)
        w1  = s * jax.random.normal(ks[3], (H, C), jnp.float32)   # Linear(C, C//4)
        b1  = s * jax.random.normal(ks[4], (H,), jnp.float32)
        w2  = s * jax.random.normal(ks[5], (C, H), jnp.float32)   # Linear(C//4, C)
        b2  = s * jax.random.normal(ks[6], (C,), jnp.float32)
        smw = s * jax.random.normal(ks[7], (C,), jnp.float32)     # Conv1d(C,1,k=1) weight
        smb = s * jax.random.normal(ks[8], (), jnp.float32)
        return x, cw, cb, w1, b1, w2, b2, smw, smb

    key = jax.random.PRNGKey(0)
    k1, k2 = jax.random.split(key)

    # Case 1: small shape, VPU spatial-gate path.  Exact f32 I/O + fast bf16 I/O.
    args1 = make_inputs(k1, 4, 8, 128)
    ref1 = ref_forward(*args1)

    out_f32 = jax.block_until_ready(soft_gating1(*args1, io_dtype=jnp.float32))
    assert out_f32.shape == ref1.shape
    err = float(jnp.max(jnp.abs(out_f32 - ref1)))
    assert jnp.allclose(out_f32, ref1, rtol=1e-3, atol=1e-4), f"f32 path max abs err {err}"

    out_bf16 = jax.block_until_ready(soft_gating1(*args1))       # default bf16 I/O
    assert out_bf16.dtype == jnp.bfloat16 and out_bf16.shape == ref1.shape
    err_bf16 = float(jnp.max(jnp.abs(out_bf16.astype(jnp.float32) - ref1)))
    assert err_bf16 < 5e-2, f"bf16 path max abs err {err_bf16}"

    # Case 2: C>=32 (MXU spatial-gate contraction), odd L (lane padding to 256), B=3.
    args2 = make_inputs(k2, 3, 32, 200)
    ref2 = ref_forward(*args2)
    out2 = jax.block_until_ready(soft_gating1(*args2, io_dtype=jnp.float32))
    assert out2.shape == ref2.shape
    err2 = float(jnp.max(jnp.abs(out2 - ref2)))
    assert jnp.allclose(out2, ref2, rtol=1e-3, atol=1e-4), f"MXU/padded-L path max abs err {err2}"

    print("KERNEL_OK")
</pallas_src>

<mosaic_0001>
module attributes {stable_mosaic.version = 11 : i64} {
  func.func @kernel(%arg0: i32, %arg1: memref<4x8x128xf32, #tpu.memory_space<vmem>>, %arg2: memref<4x8xf32, #tpu.memory_space<vmem>>, %arg3: memref<3x8x1xf32, #tpu.memory_space<vmem>>, %arg4: memref<8x2xf32, #tpu.memory_space<vmem>>, %arg5: memref<1x2xf32, #tpu.memory_space<vmem>>, %arg6: memref<2x8xf32, #tpu.memory_space<vmem>>, %arg7: memref<1x8xf32, #tpu.memory_space<vmem>>, %arg8: memref<1x1xf32, #tpu.memory_space<vmem>>, %arg9: memref<4x8x128xf32, #tpu.memory_space<vmem>>) attributes {dimension_semantics = [#tpu.dimension_semantics<parallel>], iteration_bounds = array<i64: 1>, scalar_prefetch = 0 : i64, scratch_operands = 0 : i64, tpu.core_type = #tpu.core_type<tc>, window_params = [{transform_indices = @transform_0, window_bounds = array<i64: 4, 8, 128>}, {pipeline_mode = #tpu.pipeline_mode<synchronous>, transform_indices = @transform_1, window_bounds = array<i64: 4, 8>}, {pipeline_mode = #tpu.pipeline_mode<synchronous>, transform_indices = @transform_2, window_bounds = array<i64: 3, 8, 1>}, {pipeline_mode = #tpu.pipeline_mode<synchronous>, transform_indices = @transform_3, window_bounds = array<i64: 8, 2>}, {pipeline_mode = #tpu.pipeline_mode<synchronous>, transform_indices = @transform_4, window_bounds = array<i64: 1, 2>}, {pipeline_mode = #tpu.pipeline_mode<synchronous>, transform_indices = @transform_5, window_bounds = array<i64: 2, 8>}, {pipeline_mode = #tpu.pipeline_mode<synchronous>, transform_indices = @transform_6, window_bounds = array<i64: 1, 8>}, {pipeline_mode = #tpu.pipeline_mode<synchronous>, transform_indices = @transform_7, window_bounds = array<i64: 1, 1>}, {transform_indices = @transform_8, window_bounds = array<i64: 4, 8, 128>}]} {
    %c0 = arith.constant 0 : index
    %c0_0 = arith.constant 0 : index
    %c0_1 = arith.constant 0 : index
    %0 = vector.load %arg1[%c0, %c0_0, %c0_1] : memref<4x8x128xf32, #tpu.memory_space<vmem>>, vector<4x8x128xf32>
    %c0_2 = arith.constant 0 : index
    %c0_3 = arith.constant 0 : index
    %1 = vector.load %arg2[%c0_2, %c0_3] : memref<4x8xf32, #tpu.memory_space<vmem>>, vector<4x8xf32>
    %cst = arith.constant dense<0.000000e+00> : vector<4x8xf32>
    %2 = vector.multi_reduction <add>, %0, %cst [2] : vector<4x8x128xf32> to vector<4x8xf32>
    %3 = vector.extract_strided_slice %0 {offsets = [0, 0, 0], sizes = [4, 8, 1], strides = [1, 1, 1]} : vector<4x8x128xf32> to vector<4x8x1xf32>
    %cst_4 = arith.constant dense<0.000000e+00> : vector<4x8xf32>
    %4 = vector.multi_reduction <add>, %3, %cst_4 [2] : vector<4x8x1xf32> to vector<4x8xf32>
    %5 = vector.extract_strided_slice %0 {offsets = [0, 0, 127], sizes = [4, 8, 1], strides = [1, 1, 1]} : vector<4x8x128xf32> to vector<4x8x1xf32>
    %cst_5 = arith.constant dense<0.000000e+00> : vector<4x8xf32>
    %6 = vector.multi_reduction <add>, %5, %cst_5 [2] : vector<4x8x1xf32> to vector<4x8xf32>
    %7 = vector.extract_strided_slice %1 {offsets = [0, 0], sizes = [1, 8], strides = [1, 1]} : vector<4x8xf32> to vector<1x8xf32>
    %8 = vector.broadcast %7 : vector<1x8xf32> to vector<4x8xf32>
    %9 = arith.mulf %2, %8 : vector<4x8xf32>
    %10 = vector.extract_strided_slice %1 {offsets = [1, 0], sizes = [1, 8], strides = [1, 1]} : vector<4x8xf32> to vector<1x8xf32>
    %11 = vector.broadcast %10 : vector<1x8xf32> to vector<4x8xf32>
    %12 = arith.mulf %6, %11 : vector<4x8xf32>
    %13 = arith.subf %9, %12 : vector<4x8xf32>
    %14 = vector.extract_strided_slice %1 {offsets = [2, 0], sizes = [1, 8], strides = [1, 1]} : vector<4x8xf32> to vector<1x8xf32>
    %15 = vector.broadcast %14 : vector<1x8xf32> to vector<4x8xf32>
    %16 = arith.mulf %4, %15 : vector<4x8xf32>
    %17 = arith.subf %13, %16 : vector<4x8xf32>
    %18 = vector.extract_strided_slice %1 {offsets = [3, 0], sizes = [1, 8], strides = [1, 1]} : vector<4x8xf32> to vector<1x8xf32>
    %19 = vector.broadcast %18 : vector<1x8xf32> to vector<4x8xf32>
    %20 = arith.addf %17, %19 : vector<4x8xf32>
    %c0_6 = arith.constant 0 : index
    %c0_7 = arith.constant 0 : index
    %21 = vector.load %arg4[%c0_6, %c0_7] : memref<8x2xf32, #tpu.memory_space<vmem>>, vector<8x2xf32>
    %cst_8 = arith.constant dense<0.000000e+00> : vector<4x2xf32>
    %22 = tpu.matmul %20, %21, %cst_8 {dimension_numbers = #tpu.dot_dimension_numbers<[1], [0], [0], [1], [0, 0, 1, 1], [], []>} : vector<4x8xf32>, vector<8x2xf32>, vector<4x2xf32> -> vector<4x2xf32>
    %c0_9 = arith.constant 0 : index
    %c0_10 = arith.constant 0 : index
    %23 = vector.load %arg5[%c0_9, %c0_10] : memref<1x2xf32, #tpu.memory_space<vmem>>, vector<1x2xf32>
    %24 = vector.broadcast %23 : vector<1x2xf32> to vector<4x2xf32>
    %25 = arith.addf %22, %24 : vector<4x2xf32>
    %cst_11 = arith.constant 0.000000e+00 : f32
    %26 = vector.broadcast %cst_11 : f32 to vector<4x2xf32>
    %27 = arith.maximumf %25, %26 : vector<4x2xf32>
    %c0_12 = arith.constant 0 : index
    %c0_13 = arith.constant 0 : index
    %28 = vector.load %arg6[%c0_12, %c0_13] : memref<2x8xf32, #tpu.memory_space<vmem>>, vector<2x8xf32>
    %cst_14 = arith.constant dense<0.000000e+00> : vector<4x8xf32>
    %29 = tpu.matmul %27, %28, %cst_14 {dimension_numbers = #tpu.dot_dimension_numbers<[1], [0], [0], [1], [0, 0, 1, 1], [], []>} : vector<4x2xf32>, vector<2x8xf32>, vector<4x8xf32> -> vector<4x8xf32>
    %c0_15 = arith.constant 0 : index
    %c0_16 = arith.constant 0 : index
    %30 = vector.load %arg7[%c0_15, %c0_16] : memref<1x8xf32, #tpu.memory_space<vmem>>, vector<1x8xf32>
    %31 = vector.broadcast %30 : vector<1x8xf32> to vector<4x8xf32>
    %32 = arith.addf %29, %31 : vector<4x8xf32>
    %33 = arith.negf %32 : vector<4x8xf32>
    %34 = math.exp %33 : vector<4x8xf32>
    %cst_17 = arith.constant 1.000000e+00 : f32
    %35 = vector.broadcast %cst_17 : f32 to vector<4x8xf32>
    %36 = arith.addf %35, %34 : vector<4x8xf32>
    %37 = arith.divf %35, %36 : vector<4x8xf32>
    %c0_18 = arith.constant 0 : index
    %c0_19 = arith.constant 0 : index
    %c0_20 = arith.constant 0 : index
    %38 = vector.load %arg3[%c0_18, %c0_19, %c0_20] : memref<3x8x1xf32, #tpu.memory_space<vmem>>, vector<3x8x1xf32>
    %39 = vector.extract_strided_slice %38 {offsets = [0, 0, 0], sizes = [1, 8, 1], strides = [1, 1, 1]} : vector<3x8x1xf32> to vector<1x8x1xf32>
    %40 = vector.broadcast %39 : vector<1x8x1xf32> to vector<4x8x128xf32>
    %41 = arith.mulf %0, %40 : vector<4x8x128xf32>
    %cst_21 = arith.constant dense<0.000000e+00> : vector<4x128xf32>
    %42 = vector.multi_reduction <add>, %41, %cst_21 [1] : vector<4x8x128xf32> to vector<4x128xf32>
    %43 = vector.extract_strided_slice %38 {offsets = [1, 0, 0], sizes = [1, 8, 1], strides = [1, 1, 1]} : vector<3x8x1xf32> to vector<1x8x1xf32>
    %44 = vector.broadcast %43 : vector<1x8x1xf32> to vector<4x8x128xf32>
    %45 = arith.mulf %0, %44 : vector<4x8x128xf32>
    %cst_22 = arith.constant dense<0.000000e+00> : vector<4x128xf32>
    %46 = vector.multi_reduction <add>, %45, %cst_22 [1] : vector<4x8x128xf32> to vector<4x128xf32>
    %47 = vector.extract_strided_slice %38 {offsets = [2, 0, 0], sizes = [1, 8, 1], strides = [1, 1, 1]} : vector<3x8x1xf32> to vector<1x8x1xf32>
    %48 = vector.broadcast %47 : vector<1x8x1xf32> to vector<4x8x128xf32>
    %49 = arith.mulf %0, %48 : vector<4x8x128xf32>
    %cst_23 = arith.constant dense<0.000000e+00> : vector<4x128xf32>
    %50 = vector.multi_reduction <add>, %49, %cst_23 [1] : vector<4x8x128xf32> to vector<4x128xf32>
    %51 = tpu.iota {dimensions = array<i32: 1>} : vector<4x128xi32>
    %c0_i32 = arith.constant 0 : i32
    %52 = vector.broadcast %c0_i32 : i32 to vector<4x128xi32>
    %53 = arith.cmpi eq, %51, %52 : vector<4x128xi32>
    %c1_i32 = arith.constant 1 : i32
    %54 = tpu.dynamic_rotate %42 by %c1_i32 dim 1 : vector<4x128xf32>, i32 -> vector<4x128xf32>
    %cst_24 = arith.constant 0.000000e+00 : f32
    %55 = vector.broadcast %cst_24 : f32 to vector<4x128xf32>
    %56 = arith.select %53, %55, %54 : vector<4x128xi1>, vector<4x128xf32>
    %c127_i32 = arith.constant 127 : i32
    %57 = vector.broadcast %c127_i32 : i32 to vector<4x128xi32>
    %58 = arith.cmpi eq, %51, %57 : vector<4x128xi32>
    %c127_i32_25 = arith.constant 127 : i32
    %59 = tpu.dynamic_rotate %50 by %c127_i32_25 dim 1 : vector<4x128xf32>, i32 -> vector<4x128xf32>
    %cst_26 = arith.constant 0.000000e+00 : f32
    %60 = vector.broadcast %cst_26 : f32 to vector<4x128xf32>
    %61 = arith.select %58, %60, %59 : vector<4x128xi1>, vector<4x128xf32>
    %62 = arith.addf %56, %46 : vector<4x128xf32>
    %63 = arith.addf %62, %61 : vector<4x128xf32>
    %c0_27 = arith.constant 0 : index
    %c0_28 = arith.constant 0 : index
    %64 = vector.load %arg8[%c0_27, %c0_28] : memref<1x1xf32, #tpu.memory_space<vmem>>, vector<1x1xf32>
    %65 = vector.broadcast %64 : vector<1x1xf32> to vector<4x128xf32>
    %66 = arith.addf %63, %65 : vector<4x128xf32>
    %67 = arith.negf %66 : vector<4x128xf32>
    %68 = math.exp %67 : vector<4x128xf32>
    %cst_29 = arith.constant 1.000000e+00 : f32
    %69 = vector.broadcast %cst_29 : f32 to vector<4x128xf32>
    %70 = arith.addf %69, %68 : vector<4x128xf32>
    %71 = arith.divf %69, %70 : vector<4x128xf32>
    %72 = vector.shape_cast %37 : vector<4x8xf32> to vector<4x8x1xf32>
    %73 = vector.broadcast %72 : vector<4x8x1xf32> to vector<4x8x128xf32>
    %74 = arith.mulf %0, %73 : vector<4x8x128xf32>
    %75 = vector.shape_cast %71 : vector<4x128xf32> to vector<4x1x128xf32>
    %76 = vector.broadcast %75 : vector<4x1x128xf32> to vector<4x8x128xf32>
    %77 = arith.mulf %74, %76 : vector<4x8x128xf32>
    %c0_30 = arith.constant 0 : index
    %c0_31 = arith.constant 0 : index
    %c0_32 = arith.constant 0 : index
    %78 = vector.load %arg9[%c0_30, %c0_31, %c0_32] : memref<4x8x128xf32, #tpu.memory_space<vmem>>, vector<4x8x128xf32>
    tpu.vector_store %arg9[%c0_30, %c0_31, %c0_32], %77 {strides = array<i32>} : memref<4x8x128xf32, #tpu.memory_space<vmem>>, vector<4x8x128xf32>,
    return
  }
  func.func @transform_0(%arg0: i32) -> (i32, i32, i32) {
    %c0_i32 = arith.constant 0 : i32
    %c0_i32_0 = arith.constant 0 : i32
    %c0_i32_1 = arith.constant 0 : i32
    return %arg0, %c0_i32, %c0_i32_0 : i32, i32, i32
  }
  func.func @transform_1(%arg0: i32) -> (i32, i32) {
    %c0_i32 = arith.constant 0 : i32
    %c0_i32_0 = arith.constant 0 : i32
    %c0_i32_1 = arith.constant 0 : i32
    return %c0_i32, %c0_i32_0 : i32, i32
  }
  func.func @transform_2(%arg0: i32) -> (i32, i32, i32) {
    %c0_i32 = arith.constant 0 : i32
    %c0_i32_0 = arith.constant 0 : i32
    %c0_i32_1 = arith.constant 0 : i32
    %c0_i32_2 = arith.constant 0 : i32
    return %c0_i32, %c0_i32_0, %c0_i32_1 : i32, i32, i32
  }
  func.func @transform_3(%arg0: i32) -> (i32, i32) {
    %c0_i32 = arith.constant 0 : i32
    %c0_i32_0 = arith.constant 0 : i32
    %c0_i32_1 = arith.constant 0 : i32
    return %c0_i32, %c0_i32_0 : i32, i32
  }
  func.func @transform_4(%arg0: i32) -> (i32, i32) {
    %c0_i32 = arith.constant 0 : i32
    %c0_i32_0 = arith.constant 0 : i32
    %c0_i32_1 = arith.constant 0 : i32
    return %c0_i32, %c0_i32_0 : i32, i32
  }
  func.func @transform_5(%arg0: i32) -> (i32, i32) {
    %c0_i32 = arith.constant 0 : i32
    %c0_i32_0 = arith.constant 0 : i32
    %c0_i32_1 = arith.constant 0 : i32
    return %c0_i32, %c0_i32_0 : i32, i32
  }
  func.func @transform_6(%arg0: i32) -> (i32, i32) {
    %c0_i32 = arith.constant 0 : i32
    %c0_i32_0 = arith.constant 0 : i32
    %c0_i32_1 = arith.constant 0 : i32
    return %c0_i32, %c0_i32_0 : i32, i32
  }
  func.func @transform_7(%arg0: i32) -> (i32, i32) {
    %c0_i32 = arith.constant 0 : i32
    %c0_i32_0 = arith.constant 0 : i32
    %c0_i32_1 = arith.constant 0 : i32
    return %c0_i32, %c0_i32_0 : i32, i32
  }
  func.func @transform_8(%arg0: i32) -> (i32, i32, i32) {
    %c0_i32 = arith.constant 0 : i32
    %c0_i32_0 = arith.constant 0 : i32
    %c0_i32_1 = arith.constant 0 : i32
    return %arg0, %c0_i32, %c0_i32_0 : i32, i32, i32
  }
}

</mosaic_0001>

<bundles_post_ra>
// kernel: tpu_custom_call.1
= control target key start
LH: loop header
LB: loop body
LE: loop exit
PB: predicated region body
PF: predicated region fallthrough
CT: control target
= control target key end

     0   :  { %s851_s0 = inlined_call_operand.vmem [shape: f32[4,8,128], index: 0, kind: input, shape index: {}]   ;;  %s852_s1 = inlined_call_operand.vmem [shape: f32[4,8], index: 1, kind: input, shape index: {}]   ;;  %s853_s2 = inlined_call_operand.vmem [shape: f32[3,8,1], index: 2, kind: input, shape index: {}]   ;;  %s854_s3 = inlined_call_operand.vmem [shape: f32[8,2], index: 3, kind: input, shape index: {}]   ;;  %s855_s4 = inlined_call_operand.vmem [shape: f32[1,2], index: 4, kind: input, shape index: {}]   ;;  %s856_s5 = inlined_call_operand.vmem [shape: f32[2,8], index: 5, kind: input, shape index: {}]   ;;  %s857_s6 = inlined_call_operand.vmem [shape: f32[1,8], index: 6, kind: input, shape index: {}]   ;;  %s858_s7 = inlined_call_operand.<no memory space> [shape: f32[1,1], index: 7, kind: input, shape index: {}]   ;;  %s859_s8 = inlined_call_operand.hbm [shape: f32[4,8,128], index: 8, kind: output, shape index: {}]  }
   0x1   :  { %v13_v0 = vstv %s858_s7 }
   0x2   :  { %14 = vst [vmem:[#allocation2] sm:$0x1] %v13_v0 }
   0x3   :  { %v49_v1 = vlaneseq  ;;  %v718_v2 = vld [vmem:[%s851_s0 + $0x8] sm:$0xff] }
   0x4   :  { %39 = vadd.xlane.f32.xlu1 %v718_v2 }
   0x5   :  { %15 = vsyncpa [#allocation4], 0  ;;  %v722_v3 = vshrl.u32 %v49_v1, 7  ;;  %v727_v4 = vld [vmem:[%s851_s0 + $0x10] sm:$0xff]  ;;  %v36_v5 = vld [vmem:[%s852_s1] sm:$0xf] }
   0x6   :  { %v739_v8 = vld [vmem:[%s851_s0 + $0x18] sm:$0xff]  ;;  %v749_v11 = vld [vmem:[%s851_s0] sm:$0xff]  ;;  %s658_s15 = smov 1   ;;  %v659_v17 = vmov 0   ;;  %v341_v50 = vld [vmem:[%s853_s2 + $0x10] sm:$0xff]  ;;  %v660_v56 = vmov 0.0  }
   0x7   :  { %v64_v6 = vsub.s32 1, %v722_v3  ;;  %v743_v9 = vsub.s32 0, %v722_v3  ;;  %v97_v12 = vsub.s32 2, %v722_v3  ;;  %625 = vset.pattern.permute.xlu0 %v659_v17  ;;  %624 = vset.pattern.permute.xlu1 %v659_v17  ;;  %v114_v19 = vsub.s32 3, %v722_v3  ;;  %v339_v55 = vld [vmem:[%s853_s2] sm:$0xff]  ;;  %v340_v58 = vld [vmem:[%s853_s2 + $0x8] sm:$0xff] }
   0x8   :  { %41 = vadd.xlane.f32.xlu1 %v727_v4  ;;  %605 = vmatprep.subr.mxu0 %v660_v56  ;;  %v125_v57 = vld [vmem:[%s854_s3] sm:$0xff]  ;;  %vm661_vm0 = vmmov 0   ;;  %v783_v59 = vand.u32 127, %v49_v1  ;;  %vm167_vm1 = vcmask 1041409   ;;  %vm169_vm2 = vcmask 1042434   ;;  %s662_s2 = smov 127  }
   0x9   :  { %v65_v7 = vrot.slane %v36_v5, %v64_v6  ;;  %v52_v10 = vrot.slane %v36_v5, %v743_v9  ;;  %v98_v13 = vrot.slane %v36_v5, %v97_v12  ;;  %v115_v21 = vrot.slane %v36_v5, %v114_v19  ;;  %v599_v53 = vld [vmem:[#allocation2] ss:$0 sm:$0xff]  ;;  %610 = vmatprep.subr.mxu1 %v660_v56 }
   0xa   :  { %606 = vmatpush3.msra.mxu0 %v125_v57  ;;  %607 = vmatprep.mubr.msk.f32.mxu0 %vm661_vm0, %v660_v56  ;;  %v153_v62 = vsub.s32 %v783_v59, %v722_v3  ;;  %vm171_vm3 = vcmask 1043459   ;;  %vm173_vm4 = vcmask 64512   ;;  %vm259_vm5 = vcmask 1041408  }
   0xb   :  { %68 = vbcast.lane.b32.xlu0 %v65_v7, 256  ;;  %612 = vmatprep.mubr.msk.f32.mxu1 %vm661_vm0, %v660_v56  ;;  %vm255_vm6 = vcmask 15360   ;;  %vm441_vm7 = vcmp.eq.s32.totalorder %v783_v59, 0  ;;  %vm453_vm8 = vcmp.eq.s32.totalorder %v783_v59, 127 }
   0xc   :  { %43 = vadd.xlane.f32.xlu1 %v739_v8 }
  0x1d   :  { %55 = vbcast.lane.b32.xlu1 %v52_v10, 256 }
  0x2a   :  { %37 = vadd.xlane.f32.xlu0 %v749_v11 }
  0x40   :  { %101 = vbcast.lane.b32.xlu0 %v98_v13, 256 }
  0x7d   :  { %v69_v14 = vpop.permute.xlu0 %68 }
  0x7e   :  { %v71_v15 = vmul.f32 %v69_v14, %v749_v11  ;;  %v72_v16 = vmul.f32 %v69_v14, %v718_v2  ;;  %v73_v18 = vmul.f32 %v69_v14, %v727_v4  ;;  %v74_v20 = vmul.f32 %v69_v14, %v739_v8 }
  0x80   :  { %79 = vrot.lane.b32.xlu1 %v71_v15, %s658_s15 }
  0x84   :  { %81 = vrot.lane.b32.xlu1 %v72_v16, %s658_s15 }
  0x88   :  { %83 = vrot.lane.b32.xlu1 %v73_v18, %s658_s15 }
  0x8c   :  { %85 = vrot.lane.b32.xlu1 %v74_v20, %s658_s15 }
  0x90   :  { %118 = vbcast.lane.b32.xlu1 %v115_v21, 256 }
  0x91   :  { %v40_v22 = vpop.xlane.xlu1 %39 }
  0x95   :  { %v42_v23 = vpop.xlane.xlu1 %41 }
  0x99   :  { %v44_v24 = vpop.xlane.xlu1 %43 }
  0x9d   :  { %v56_v25 = vpop.permute.xlu1 %55 }
  0x9e   :  { %v60_v32 = vmul.f32 %v56_v25, %v42_v23  ;;  %v59_v38 = vmul.f32 %v56_v25, %v40_v22  ;;  %v61_v39 = vmul.f32 %v56_v25, %v44_v24 }
  0xb7   :  { %v38_v27 = vpop.xlane.xlu0 %37 }
  0xb8   :  { %v58_v31 = vmul.f32 %v56_v25, %v38_v27 }
  0xbb   :  { %v102_v29 = vpop.permute.xlu0 %101 }
  0xbc   :  { %v104_v33 = vmul.f32 %v102_v29, %v749_v11  ;;  %v106_v35 = vmul.f32 %v102_v29, %v727_v4  ;;  %v105_v41 = vmul.f32 %v102_v29, %v718_v2  ;;  %v107_v45 = vmul.f32 %v102_v29, %v739_v8 }
  0xf2   :  { %v80_v26 = vpop.permute.xlu1 %79 }
  0xf3   :  { %v91_v34 = vsub.f32 %v58_v31, %v80_v26 }
  0xf5   :  { %v108_v40 = vsub.f32 %v91_v34, %v104_v33 }
  0xf6   :  { %v82_v28 = vpop.permute.xlu1 %81 }
  0xf7   :  { %v92_v42 = vsub.f32 %v59_v38, %v82_v28 }
  0xf9   :  { %v109_v49 = vsub.f32 %v92_v42, %v105_v41 }
  0xfa   :  { %v84_v30 = vpop.permute.xlu1 %83 }
  0xfb   :  { %v93_v36 = vsub.f32 %v60_v32, %v84_v30 }
  0xfd   :  { %v110_v43 = vsub.f32 %v93_v36, %v106_v35 }
  0xfe   :  { %v86_v37 = vpop.permute.xlu1 %85 }
  0xff   :  { %v94_v46 = vsub.f32 %v61_v39, %v86_v37 }
 0x101   :  { %v111_v51 = vsub.f32 %v94_v46, %v107_v45 }
 0x102   :  { %v119_v44 = vpop.permute.xlu1 %118 }
 0x103   :  { %v123_v47 = vadd.f32 %v119_v44, %v110_v43  ;;  %v121_v48 = vadd.f32 %v119_v44, %v108_v40  ;;  %v122_v52 = vadd.f32 %v119_v44, %v109_v49  ;;  %v124_v54 = vadd.f32 %v119_v44, %v111_v51 }
 0x105   :  { %144 = vperm.xlu0 %625, %v123_v47   ;;  %138 = vperm.xlu1 %624, %v121_v48  }
 0x109   :  { %410 = vperm.xlu0 %625, %v341_v50   ;;  %141 = vperm.xlu1 %624, %v122_v52  }
 0x10d   :  { %482 = vperm.xlu0 %625, %v599_v53   ;;  %147 = vperm.xlu1 %624, %v124_v54  }
 0x111   :  { %344 = vperm.xlu1 %624, %v339_v55  }
 0x115   :  { %377 = vperm.xlu1 %624, %v340_v58  }
 0x184   :  { %v145_v60 = vpop.permute.xlu0 %144  ;;  %v139_v61 = vpop.permute.xlu1 %138 }
 0x185   :  { %v154_v14 = vrot.slane %v139_v61, %v153_v62  ;;  %v162_v20 = vrot.slane %v145_v60, %v153_v62 }
 0x188   :  { %v411_v63 = vpop.permute.xlu0 %410  ;;  %v142_v0 = vpop.permute.xlu1 %141 }
 0x189   :  { %v413_v5 = vmul.f32 %v411_v63, %v749_v11  ;;  %v414_v7 = vmul.f32 %v411_v63, %v718_v2  ;;  %v415_v10 = vmul.f32 %v411_v63, %v727_v4  ;;  %v416_v13 = vmul.f32 %v411_v63, %v739_v8 }
 0x18a   :  { %v158_v15 = vrot.slane %v142_v0, %v153_v62 }
 0x18b   :  { %v417_v1 = vrot.slane %v413_v5, 4  ;;  %v423_v16 = vrot.slane %v414_v7, 4  ;;  %v429_v17 = vrot.slane %v415_v10, 4  ;;  %v435_v18 = vrot.slane %v416_v13, 4 }
 0x18c   :  { %v168_v21 = vsel %vm167_vm1, %v158_v15, %v154_v14  ;;  %v148_v22 = vpop.permute.xlu1 %147 }
 0x18d   :  { %v418_v23 = vadd.f32 %v417_v1, %v413_v5  ;;  %v424_v24 = vadd.f32 %v423_v16, %v414_v7  ;;  %v430_v25 = vadd.f32 %v429_v17, %v415_v10  ;;  %v436_v26 = vadd.f32 %v435_v18, %v416_v13 }
 0x18e   :  { %v166_v27 = vrot.slane %v148_v22, %v153_v62  ;;  %v170_v28 = vsel %vm169_vm2, %v162_v20, %v168_v21 }
 0x18f   :  { %v419_v29 = vrot.slane %v418_v23, 2  ;;  %v425_v30 = vrot.slane %v424_v24, 2  ;;  %v431_v31 = vrot.slane %v430_v25, 2  ;;  %v437_v32 = vrot.slane %v436_v26, 2 }
 0x190   :  { %v172_v33 = vsel %vm171_vm3, %v166_v27, %v170_v28  ;;  %v345_v34 = vpop.permute.xlu1 %344 }
 0x191   :  { %v420_v35 = vadd.f32 %v419_v29, %v418_v23  ;;  %v426_v36 = vadd.f32 %v425_v30, %v424_v24  ;;  %v432_v37 = vadd.f32 %v431_v31, %v430_v25  ;;  %608 = vmatmul.mubr.msk.f32.vlgmr.msra.gmra.mrb[0].mxu0 %vm173_vm4, %v172_v33  ;;  %v347_v38 = vmul.f32 %v345_v34, %v749_v11 }
 0x192   :  { %v348_v39 = vmul.f32 %v345_v34, %v718_v2  ;;  %v349_v40 = vmul.f32 %v345_v34, %v727_v4  ;;  %v350_v41 = vmul.f32 %v345_v34, %v739_v8  ;;  %v438_v42 = vadd.f32 %v437_v32, %v436_v26 }
 0x193   :  { %v421_v43 = vrot.slane %v420_v35, 1  ;;  %v427_v44 = vrot.slane %v426_v36, 1  ;;  %v351_v45 = vrot.slane %v347_v38, 4  ;;  %v433_v46 = vrot.slane %v432_v37, 1 }
 0x194   :  { %v357_v47 = vrot.slane %v348_v39, 4  ;;  %v363_v48 = vrot.slane %v349_v40, 4  ;;  %v369_v49 = vrot.slane %v350_v41, 4  ;;  %v378_v50 = vpop.permute.xlu1 %377  ;;  %v439_v51 = vrot.slane %v438_v42, 1 }
 0x195   :  { %v352_v52 = vadd.f32 %v351_v45, %v347_v38  ;;  %v380_v53 = vmul.f32 %v378_v50, %v749_v11  ;;  %v381_v54 = vmul.f32 %v378_v50, %v718_v2  ;;  %v382_v55 = vmul.f32 %v378_v50, %v727_v4 }
 0x196   :  { %v358_v56 = vadd.f32 %v357_v47, %v348_v39  ;;  %v364_v57 = vadd.f32 %v363_v48, %v349_v40  ;;  %v370_v58 = vadd.f32 %v369_v49, %v350_v41  ;;  %v383_v60 = vmul.f32 %v378_v50, %v739_v8 }
 0x197   :  { %v353_v61 = vrot.slane %v352_v52, 2  ;;  %v384_v62 = vrot.slane %v380_v53, 4  ;;  %v390_v63 = vrot.slane %v381_v54, 4  ;;  %v396_v0 = vrot.slane %v382_v55, 4 }
 0x198   :  { %v359_v5 = vrot.slane %v358_v56, 2  ;;  %v365_v7 = vrot.slane %v364_v57, 2  ;;  %v371_v10 = vrot.slane %v370_v58, 2  ;;  %v402_v13 = vrot.slane %v383_v60, 4 }
 0x199   :  { %v354_v14 = vadd.f32 %v353_v61, %v352_v52  ;;  %v385_v15 = vadd.f32 %v384_v62, %v380_v53  ;;  %v391_v1 = vadd.f32 %v390_v63, %v381_v54  ;;  %v397_v16 = vadd.f32 %v396_v0, %v382_v55  ;;  %v593_v61 = vld [vmem:[%s855_s4] ss:$0 sm:$0xff]  ;;  %s664_s4 = smov [#allocation3]  }
 0x19a   :  { %v360_v17 = vadd.f32 %v359_v5, %v358_v56  ;;  %v366_v18 = vadd.f32 %v365_v7, %v364_v57  ;;  %v403_v20 = vadd.f32 %v402_v13, %v383_v60  ;;  %v422_v21 = vadd.f32 %v421_v43, %v420_v35  ;;  %v247_v60 = vld [vmem:[%s856_s5] sm:$0x3]  ;;  %s582_s5 = sshll.u32 %s664_s4, 4  ;;  %s583_s5 = int_to_ptr.vmem [resolvable:$true] %s582_s5 }
 0x19b   :  { %v355_v22 = vrot.slane %v354_v14, 1  ;;  %v386_v23 = vrot.slane %v385_v15, 2  ;;  %v392_v24 = vrot.slane %v391_v1, 2  ;;  %v398_v25 = vrot.slane %v397_v16, 2  ;;  %611 = vmatpush3.msk.msra.mxu1 %vm259_vm5, %v247_v60  ;;  %v595_v7 = vld [vmem:[%s857_s6] ss:$0 sm:$0xff]  ;;  %p639_p1 = scmp.lt.s32.totalorder %s583_s5, %s583_s5 }
 0x19c   :  { %v361_v26 = vrot.slane %v360_v17, 1  ;;  %v404_v27 = vrot.slane %v403_v20, 2  ;;  %v428_v28 = vadd.f32 %v427_v44, %v426_v36  ;;  %v434_v29 = vadd.f32 %v433_v46, %v432_v37  ;;  %s634_s6 = scalar_lea.vmem %s583_s5, 512 }
 0x19d   :  { %v387_v30 = vadd.f32 %v386_v23, %v385_v15  ;;  %v393_v31 = vadd.f32 %v392_v24, %v391_v1  ;;  %v399_v32 = vadd.f32 %v398_v25, %v397_v16  ;;  %v440_v33 = vadd.f32 %v439_v51, %v438_v42  ;;  %v483_v24 = vpop.permute.xlu0 %482  ;;  %p635_p0 = scmp.ne.s32.totalorder %s583_s5, %s634_s6  ;;  %p640_p2 = scmp.lt.s32.totalorder %s634_s6, %s634_s6 }
 0x19e   :  { %v458_v34 = vsel %vm167_vm1, %v428_v28, %v422_v21  ;;  %v356_v38 = vadd.f32 %v355_v22, %v354_v14  ;;  %v362_v39 = vadd.f32 %v361_v26, %v360_v17  ;;  %v367_v40 = vrot.slane %v366_v18, 1 }
 0x19f   :  { %v388_v41 = vrot.slane %v387_v30, 1  ;;  %v394_v45 = vrot.slane %v393_v31, 1  ;;  %v459_v35 = vsel %vm169_vm2, %v434_v29, %v458_v34  ;;  %v372_v43 = vadd.f32 %v371_v10, %v370_v58  ;;  %p641_p3 = por %p640_p2, %p639_p1 }
 0x1a0   :  { %v460_v47 = vsel %vm171_vm3, %v440_v33, %v459_v35  ;;  %v368_v48 = vadd.f32 %v367_v40, %v366_v18  ;;  %v446_v36 = vsel %vm167_vm1, %v362_v39, %v356_v38  ;;  %v400_v37 = vrot.slane %v399_v32, 1 }
 0x1a1   :  { %462 = vrot.lane.b32.xlu0 %v460_v47, %s662_s2  ;;  %v373_v44 = vrot.slane %v372_v43, 1  ;;  %v389_v42 = vadd.f32 %v388_v41, %v387_v30  ;;  %v395_v46 = vadd.f32 %v394_v45, %v393_v31  ;;  %v405_v49 = vadd.f32 %v404_v27, %v403_v20  ;;  %p642_p4 = pnand %p641_p3, %p635_p0 }
 0x1a2   :  { %v447_v50 = vsel %vm169_vm2, %v368_v48, %v446_v36  ;;  %v401_v51 = vadd.f32 %v400_v37, %v399_v32 }
 0x1a3   :  { %v374_v52 = vadd.f32 %v373_v44, %v372_v43  ;;  %v406_v53 = vrot.slane %v405_v49, 1  ;;  %v469_v54 = vsel %vm167_vm1, %v395_v46, %v389_v42 }
 0x1a4   :  { %v470_v55 = vsel %vm169_vm2, %v401_v51, %v469_v54 }
 0x1a5   :  { %v448_v56 = vsel %vm171_vm3, %v374_v52, %v447_v50  ;;  %v407_v57 = vadd.f32 %v406_v53, %v405_v49 }
 0x1a6   :  { %450 = vrot.lane.b32.xlu1 %v448_v56, %s658_s15 }
 0x1a7   :  { %v471_v58 = vsel %vm171_vm3, %v407_v57, %v470_v55 }
 0x218   :  { %v451_v23 = vpop.permute.xlu1 %450 }
 0x219   :  { %v452_v25 = vsel %vm441_vm7, 0.0, %v451_v23 }
 0x21a   :  { %v473_v26 = vadd.f32 %v471_v58, %v452_v25 }
 0x264   :  { %v242_v62 = vpop.f32.mrb[0].mxu0 }
 0x265   :  { %v243_v63 = vadd.f32 %v593_v61, %v242_v62  ;;  %v609_v0 = vpop.f32.mrb[1].mxu0 }
 0x267   :  { %v246_v5 = vmax.f32 %v243_v63, 0.0 }
 0x269   :  { %613 = vmatmul.mubr.msk.f32.vlgmr.msra.gmra.mrb[0].mxu1 %vm255_vm6, %v246_v5 }
 0x33c   :  { %v329_v10 = vpop.f32.mrb[0].mxu1 }
 0x33d   :  { %v330_v13 = vadd.f32 %v595_v7, %v329_v10  ;;  %v614_v14 = vpop.f32.mrb[1].mxu1 }
 0x33f   :  { %v598_v15 = vmul.f32 -1.442695, %v330_v13 }
 0x341   :  { %626 = vpow2.f32 %v598_v15 }
 0x34b   :  { %v627_v1 = vpop.eup %626 }
 0x34c   :  { %v336_v16 = vadd.f32 1.0, %v627_v1 }
 0x34e   :  { %628 = vrcp.f32 %v336_v16 }
 0x358   :  { %v629_v17 = vpop.eup %628 }
 0x359   :  { %v502_v18 = vrot.slane %v629_v17, %v64_v6  ;;  %v495_v20 = vrot.slane %v629_v17, %v743_v9  ;;  %v516_v21 = vrot.slane %v629_v17, %v114_v19  ;;  %v509_v22 = vrot.slane %v629_v17, %v97_v12  ;;  %v463_v6 = vpop.permute.xlu0 %462 }
 0x35a   :  { %v464_v27 = vsel %vm453_vm8, 0.0, %v463_v6  ;;  %v663_v12 = vmov 1966171168  }
 0x35b   :  { %504 = vbcast.lane.b32.xlu0 %v502_v18, 256  ;;  %497 = vbcast.lane.b32.xlu1 %v495_v20, 256  ;;  %v474_v28 = vadd.f32 %v473_v26, %v464_v27  ;;  %v526_v32 = vunpack.c.l.s4 %v663_v12 }
 0x35d   :  { %v485_v29 = vadd.f32 %v483_v24, %v474_v28  ;;  %v527_v33 = vunpack.c.0.s8 %v526_v32 }
 0x35f   :  { %518 = vbcast.lane.b32.xlu0 %v516_v21, 256  ;;  %511 = vbcast.lane.b32.xlu1 %v509_v22, 256  ;;  %v600_v30 = vmul.f32 -1.442695, %v485_v29  ;;  %v530_v34 = vsub.s32 %v527_v33, %v722_v3 }
 0x361   :  { %630 = vpow2.f32 %v600_v30 }
 0x36b   :  { %v631_v19 = vpop.eup %630 }
 0x36c   :  { %v489_v31 = vadd.f32 1.0, %v631_v19 }
 0x36e   :  { %632 = vrcp.f32 %v489_v31 }
 0x378   :  { %v633_v38 = vpop.eup %632 }
 0x379   :  { %v531_v39 = vrot.slane %v633_v38, %v530_v34 }
 0x37b   :  { %v532_v40 = vcombine.high %v531_v39, %v531_v39  ;;  %v539_v41 = vrot.slane %v531_v39, %v530_v34 }
 0x37d   :  { %v546_v59 = vrot.slane %v532_v40, %v530_v34  ;;  %v552_v35 = vrot.slane %v539_v41, %v743_v9  ;;  %v547_v47 = vcombine.high %v539_v41, %v539_v41 }
 0x37f   :  { %v556_v36 = vrot.slane %v546_v59, %v743_v9  ;;  %v548_v44 = vcombine.high %v546_v59, %v546_v59  ;;  %v560_v52 = vrot.slane %v547_v47, %v743_v9 }
 0x381   :  { %v564_v51 = vrot.slane %v548_v44, %v743_v9 }
 0x3cd   :  { %v505_v45 = vpop.permute.xlu0 %504  ;;  %v498_v43 = vpop.permute.xlu1 %497 }
 0x3ce   :  { %v521_v48 = vmul.f32 %v505_v45, %v718_v2  ;;  %v520_v37 = vmul.f32 %v498_v43, %v749_v11 }
 0x3d0   :  { %v570_v42 = vmul.f32 %v556_v36, %v521_v48  ;;  %v569_v46 = vmul.f32 %v552_v35, %v520_v37 }
 0x3d1   :  { %v519_v3 = vpop.permute.xlu0 %518  ;;  %v512_v49 = vpop.permute.xlu1 %511 }
 0x3d2   :  { %574 = vst [vmem:[#allocation3 + $0x8] sm:$0xff] %v570_v42  ;;  %573 = vst [vmem:[#allocation3] sm:$0xff] %v569_v46  ;;  %v523_v50 = vmul.f32 %v519_v3, %v739_v8  ;;  %v522_v2 = vmul.f32 %v512_v49, %v727_v4 }
 0x3d4   :  { %v572_v53 = vmul.f32 %v564_v51, %v523_v50  ;;  %v571_v54 = vmul.f32 %v560_v52, %v522_v2 }
 0x3d6   :  { %576 = vst [vmem:[#allocation3 + $0x18] sm:$0xff] %v572_v53  ;;  %575 = vst [vmem:[#allocation3 + $0x10] sm:$0xff] %v571_v54 }
 0x3d7   :  { %645 = shalt.err (!%p642_p4)
}
 0x3d8   :  { %s646_s30 = scalar_lea.hbm %s859_s8, 512 }
 0x3d9   :  { %p647_p5 = scmp.ne.s32.totalorder %s859_s8, %s646_s30  ;;  %p650_p6 = scmp.lt.u32.totalorder %s646_s30, %s859_s8 }
 0x3db   :  { %p652_p7 = pnand %p650_p6, %p647_p5 }
 0x3dd   :  { %655 = shalt.err (!%p652_p7)
}
 0x3de   :  { %s665_s12 = smov 128   ;;  %s666_s13 = smov 8  }
 0x3df   :  { %588 = dma.vmem_to_hbm [thread:$0]  %s583_s5, 512, %s859_s8, [#allocation4], %s665_s12, %s665_s12, %s666_s13  }
 0x3e0   :  { %656 = dma.done.wait [#allocation4], 512  }
 0x3e1   :  { %657 = vsyncadd [#allocation4], 4294966784 }
 0x3e2   :  { %592 = vsyncpa [#allocation4], 1 }

</bundles_post_ra>
